<compile_context>
chip_gen: v7x
topology: tpu7x:2x2x1
jax: 0.10.0
libtpu: 0.0.40
codegen_flags: <defaults>
</compile_context>

<pallas_src>
import functools

import jax
import jax.numpy as jnp
from jax.experimental import pallas as pl
from jax.experimental.pallas import tpu as pltpu

_LANES = 128


def _chip_config():
    """Returns (streaming tile rows, number of TensorCore splits)."""
    try:
        kind = jax.devices()[0].device_kind.lower()
    except Exception:
        kind = ""
    # 4 MiB/input blocks where scoped VMEM is comfortable (v6e: 32/128 MiB,
    # v7x: 32/64 MiB), 2 MiB/input on v5e / unknown chips (16 MiB default).
    if ("v6" in kind) or ("v7" in kind):
        tile_rows = 8192
    else:
        tile_rows = 4096
    # Two TensorCores per chip only on v7x-class parts.
    num_splits = 2 if "v7" in kind else 1
    return tile_rows, num_splits


def _l1_partial_kernel(p_ref, t_ref, o_ref, acc_ref, *,
                       tile_rows, acc_rows, blocks_per_split, rows_valid):
    c = pl.program_id(0)   # TensorCore split ("parallel")
    i = pl.program_id(1)   # streaming / reduction axis ("arbitrary")

    @pl.when(i == 0)
    def _():
        acc_ref[...] = jnp.zeros_like(acc_ref)

    # Keep inputs in their storage dtype through the DMA; cast in-kernel.
    ad = jnp.abs(p_ref[...].astype(jnp.float32) - t_ref[...].astype(jnp.float32))

    folds = tile_rows // acc_rows
    row0 = (c * blocks_per_split + i) * tile_rows

    # Hot path: block fully in range -> no iota/compare/select.
    @pl.when(row0 + tile_rows <= rows_valid)
    def _():
        acc_ref[...] += ad.reshape(folds, acc_rows, _LANES).sum(axis=0)

    # Boundary path: partial last block and clamped re-read blocks.  The
    # OOB-padded rows may hold garbage (possibly NaN/Inf), so this must stay
    # a select (jnp.where), never a multiply-by-mask.
    @pl.when(row0 + tile_rows > rows_valid)
    def _():
        row_idx = jax.lax.broadcasted_iota(jnp.int32, (tile_rows, _LANES), 0) + row0
        masked = jnp.where(row_idx < rows_valid, ad, 0.0)
        acc_ref[...] += masked.reshape(folds, acc_rows, _LANES).sum(axis=0)

    @pl.when(i == pl.num_programs(1) - 1)
    def _():
        o_ref[...] = acc_ref[...]


@jax.jit
def l1_loss(y_pred: jax.Array, y_true: jax.Array) -> jax.Array:
    """mean(|y_pred - y_true|) computed with a Pallas TPU streaming kernel."""
    assert y_pred.shape == y_true.shape
    n_elems = y_pred.size
    f32 = jnp.float32

    flat_p = jnp.ravel(y_pred)
    flat_t = jnp.ravel(y_true)

    rows = n_elems // _LANES
    # Lane-ragged or tiny inputs: plain JAX.  A prefix slice to feed the
    # kernel would force XLA to materialize near-full-size HBM copies of both
    # inputs (~2x traffic), which dwarfs any in-kernel win.
    # TODO(synk): cover n_elems % 128 != 0 in-kernel via manual DMA
    # (memory_space=pl.ANY) if large lane-ragged inputs ever matter.
    if (n_elems % _LANES != 0) or rows < 8:
        return jnp.mean(jnp.abs(flat_p.astype(f32) - flat_t.astype(f32)))

    chip_tile_rows, num_splits = _chip_config()

    if rows <= chip_tile_rows:
        tile_rows = rows                 # full-extent block (always legal)
    else:
        tile_rows = chip_tile_rows       # multiple of 8

    blocks_total = pl.cdiv(rows, tile_rows)   # last block may be Pallas-padded
    num_splits = min(num_splits, blocks_total)
    blocks_per_split = pl.cdiv(blocks_total, num_splits)

    # Wide accumulator (up to 64 rows = 8 vregs) -> independent VALU chains.
    acc_rows = next((r for r in (64, 32, 16, 8) if tile_rows % r == 0), tile_rows)

    slab_p = flat_p.reshape(rows, _LANES)     # free reshape, never a copy
    slab_t = flat_t.reshape(rows, _LANES)

    def in_map(c, i):
        # Clamp out-of-range blocks of the second split; the in-kernel row
        # mask zeroes their contribution.
        return (jnp.minimum(c * blocks_per_split + i, blocks_total - 1), 0)

    kernel = functools.partial(
        _l1_partial_kernel,
        tile_rows=tile_rows,
        acc_rows=acc_rows,
        blocks_per_split=blocks_per_split,
        rows_valid=rows,
    )

    # Explicit VMEM budget: 2 inputs x 2 pipeline buffers + headroom for the
    # full-block elementwise temporaries and Mosaic internal scratch.
    block_f32_bytes = tile_rows * _LANES * 4
    vmem_limit = max(16 << 20, 7 * block_f32_bytes + (4 << 20))

    partials = pl.pallas_call(
        kernel,
        out_shape=jax.ShapeDtypeStruct((num_splits * acc_rows, _LANES), f32),
        grid_spec=pltpu.PrefetchScalarGridSpec(
            num_scalar_prefetch=0,
            grid=(num_splits, blocks_per_split),
            in_specs=[
                pl.BlockSpec((tile_rows, _LANES), in_map),
                pl.BlockSpec((tile_rows, _LANES), in_map),
            ],
            out_specs=pl.BlockSpec((acc_rows, _LANES), lambda c, i: (c, 0)),
            scratch_shapes=[pltpu.VMEM((acc_rows, _LANES), f32)],
        ),
        compiler_params=pltpu.CompilerParams(
            dimension_semantics=("parallel", "arbitrary"),
            vmem_limit_bytes=vmem_limit,
        ),
    )(slab_p, slab_t)

    # Final tiny fold + mean.  (loss.mean() on a 0-d tensor is itself.)
    return jnp.sum(partials) * (1.0 / float(n_elems))


if __name__ == "__main__":
    key = jax.random.PRNGKey(0)
    k1, k2, k3, k4, k5, k6 = jax.random.split(key, 6)

    # Primary check: small 4-D NCHW-style input (lane-aligned -> kernel path).
    shape = (2, 4, 16, 16)
    y_pred = jax.random.normal(k1, shape, dtype=jnp.float32)
    y_true = jax.random.normal(k2, shape, dtype=jnp.float32)
    loss = l1_loss(y_pred, y_true)
    jax.block_until_ready(loss)
    ref = jnp.mean(jnp.abs(y_pred - y_true))
    assert jnp.allclose(loss, ref, rtol=1e-5, atol=1e-6), (loss, ref)

    # Lane-ragged size: exercised via the copy-free JAX fallback path.
    shape2 = (3, 5, 9, 11)
    a = jax.random.normal(k3, shape2, dtype=jnp.float32)
    b = jax.random.normal(k4, shape2, dtype=jnp.float32)
    loss2 = l1_loss(a, b)
    jax.block_until_ready(loss2)
    ref2 = jnp.mean(jnp.abs(a - b))
    assert jnp.allclose(loss2, ref2, rtol=1e-5, atol=1e-6), (loss2, ref2)

    # Multi-block case with a partial last block: exercises the streaming
    # accumulator, the boundary mask, and (on v7x) the 2-way core split.
    shape3 = (8216, 128)
    c = jax.random.normal(k5, shape3, dtype=jnp.float32)
    d = jax.random.normal(k6, shape3, dtype=jnp.float32)
    loss3 = l1_loss(c, d)
    jax.block_until_ready(loss3)
    ref3 = jnp.mean(jnp.abs(c - d))
    assert jnp.allclose(loss3, ref3, rtol=1e-5, atol=1e-6), (loss3, ref3)

    print("KERNEL_OK")
</pallas_src>

<mosaic_0001>
module attributes {stable_mosaic.version = 11 : i64} {
  func.func @_l1_partial_kernel(%arg0: i32, %arg1: i32, %arg2: memref<16x128xf32, #tpu.memory_space<vmem>>, %arg3: memref<16x128xf32, #tpu.memory_space<vmem>>, %arg4: memref<16x128xf32, #tpu.memory_space<vmem>>, %arg5: memref<16x128xf32, #tpu.memory_space<vmem>>) attributes {dimension_semantics = [#tpu.dimension_semantics<parallel>, #tpu.dimension_semantics<arbitrary>], iteration_bounds = array<i64: 1, 1>, scalar_prefetch = 0 : i64, scratch_operands = 1 : i64, tpu.core_type = #tpu.core_type<tc>, window_params = [{transform_indices = @transform_0, window_bounds = array<i64: 16, 128>}, {transform_indices = @transform_1, window_bounds = array<i64: 16, 128>}, {transform_indices = @transform_2, window_bounds = array<i64: 16, 128>}]} {
    %c0_i32 = arith.constant 0 : i32
    %0 = arith.cmpi eq, %arg1, %c0_i32 : i32
    %1 = arith.extui %0 : i1 to i32
    %c0_i32_0 = arith.constant 0 : i32
    %2 = arith.cmpi ne, %1, %c0_i32_0 : i32
    scf.if %2 {
      %cst = arith.constant 0.000000e+00 : f32
      %21 = vector.broadcast %cst : f32 to vector<16x128xf32>
      %c0_12 = arith.constant 0 : index
      %c0_13 = arith.constant 0 : index
      %22 = vector.load %arg5[%c0_12, %c0_13] : memref<16x128xf32, #tpu.memory_space<vmem>>, vector<16x128xf32>
      tpu.vector_store %arg5[%c0_12, %c0_13], %21 {strides = array<i32>} : memref<16x128xf32, #tpu.memory_space<vmem>>, vector<16x128xf32>,
    } else {
    }
    %c0 = arith.constant 0 : index
    %c0_1 = arith.constant 0 : index
    %3 = vector.load %arg2[%c0, %c0_1] : memref<16x128xf32, #tpu.memory_space<vmem>>, vector<16x128xf32>
    %c0_2 = arith.constant 0 : index
    %c0_3 = arith.constant 0 : index
    %4 = vector.load %arg3[%c0_2, %c0_3] : memref<16x128xf32, #tpu.memory_space<vmem>>, vector<16x128xf32>
    %5 = arith.subf %3, %4 : vector<16x128xf32>
    %6 = math.absf %5 : vector<16x128xf32>
    %c1_i32 = arith.constant 1 : i32
    %7 = arith.muli %arg0, %c1_i32 : i32
    %8 = arith.addi %7, %arg1 : i32
    %c16_i32 = arith.constant 16 : i32
    %9 = arith.muli %8, %c16_i32 : i32
    %c16_i32_4 = arith.constant 16 : i32
    %10 = arith.addi %9, %c16_i32_4 : i32
    %c16_i32_5 = arith.constant 16 : i32
    %11 = arith.cmpi sle, %10, %c16_i32_5 : i32
    %12 = arith.extui %11 : i1 to i32
    %c0_i32_6 = arith.constant 0 : i32
    %13 = arith.cmpi ne, %12, %c0_i32_6 : i32
    scf.if %13 {
      %c0_12 = arith.constant 0 : index
      %c0_13 = arith.constant 0 : index
      %21 = vector.load %arg5[%c0_12, %c0_13] : memref<16x128xf32, #tpu.memory_space<vmem>>, vector<16x128xf32>
      %22 = vector.shape_cast %6 : vector<16x128xf32> to vector<1x16x128xf32>
      %cst = arith.constant dense<0.000000e+00> : vector<16x128xf32>
      %23 = vector.multi_reduction <add>, %22, %cst [0] : vector<1x16x128xf32> to vector<16x128xf32>
      %24 = arith.addf %21, %23 : vector<16x128xf32>
      %c0_14 = arith.constant 0 : index
      %c0_15 = arith.constant 0 : index
      %25 = vector.load %arg5[%c0_14, %c0_15] : memref<16x128xf32, #tpu.memory_space<vmem>>, vector<16x128xf32>
      tpu.vector_store %arg5[%c0_14, %c0_15], %24 {strides = array<i32>} : memref<16x128xf32, #tpu.memory_space<vmem>>, vector<16x128xf32>,
    } else {
    }
    %c16_i32_7 = arith.constant 16 : i32
    %14 = arith.addi %9, %c16_i32_7 : i32
    %c16_i32_8 = arith.constant 16 : i32
    %15 = arith.cmpi sgt, %14, %c16_i32_8 : i32
    %16 = arith.extui %15 : i1 to i32
    %c0_i32_9 = arith.constant 0 : i32
    %17 = arith.cmpi ne, %16, %c0_i32_9 : i32
    scf.if %17 {
      %21 = tpu.iota {dimensions = array<i32: 0>} : vector<16x128xi32>
      %22 = vector.broadcast %9 : i32 to vector<16x128xi32>
      %23 = arith.addi %21, %22 : vector<16x128xi32>
      %c16_i32_12 = arith.constant 16 : i32
      %24 = vector.broadcast %c16_i32_12 : i32 to vector<16x128xi32>
      %25 = arith.cmpi slt, %23, %24 : vector<16x128xi32>
      %cst = arith.constant 0.000000e+00 : f32
      %26 = vector.broadcast %cst : f32 to vector<16x128xf32>
      %27 = arith.select %25, %6, %26 : vector<16x128xi1>, vector<16x128xf32>
      %c0_13 = arith.constant 0 : index
      %c0_14 = arith.constant 0 : index
      %28 = vector.load %arg5[%c0_13, %c0_14] : memref<16x128xf32, #tpu.memory_space<vmem>>, vector<16x128xf32>
      %29 = vector.shape_cast %27 : vector<16x128xf32> to vector<1x16x128xf32>
      %cst_15 = arith.constant dense<0.000000e+00> : vector<16x128xf32>
      %30 = vector.multi_reduction <add>, %29, %cst_15 [0] : vector<1x16x128xf32> to vector<16x128xf32>
      %31 = arith.addf %28, %30 : vector<16x128xf32>
      %c0_16 = arith.constant 0 : index
      %c0_17 = arith.constant 0 : index
      %32 = vector.load %arg5[%c0_16, %c0_17] : memref<16x128xf32, #tpu.memory_space<vmem>>, vector<16x128xf32>
      tpu.vector_store %arg5[%c0_16, %c0_17], %31 {strides = array<i32>} : memref<16x128xf32, #tpu.memory_space<vmem>>, vector<16x128xf32>,
    } else {
    }
    %c0_i32_10 = arith.constant 0 : i32
    %18 = arith.cmpi eq, %arg1, %c0_i32_10 : i32
    %19 = arith.extui %18 : i1 to i32
    %c0_i32_11 = arith.constant 0 : i32
    %20 = arith.cmpi ne, %19, %c0_i32_11 : i32
    scf.if %20 {
      %c0_12 = arith.constant 0 : index
      %c0_13 = arith.constant 0 : index
      %21 = vector.load %arg5[%c0_12, %c0_13] : memref<16x128xf32, #tpu.memory_space<vmem>>, vector<16x128xf32>
      %c0_14 = arith.constant 0 : index
      %c0_15 = arith.constant 0 : index
      %22 = vector.load %arg4[%c0_14, %c0_15] : memref<16x128xf32, #tpu.memory_space<vmem>>, vector<16x128xf32>
      tpu.vector_store %arg4[%c0_14, %c0_15], %21 {strides = array<i32>} : memref<16x128xf32, #tpu.memory_space<vmem>>, vector<16x128xf32>,
    } else {
    }
    return
  }
  func.func @transform_0(%arg0: i32, %arg1: i32) -> (i32, i32) {
    %c1_i32 = arith.constant 1 : i32
    %0 = arith.muli %arg0, %c1_i32 : i32
    %1 = arith.addi %0, %arg1 : i32
    %c0_i32 = arith.constant 0 : i32
    %2 = arith.minsi %1, %c0_i32 : i32
    %c0_i32_0 = arith.constant 0 : i32
    %c0_i32_1 = arith.constant 0 : i32
    return %2, %c0_i32_0 : i32, i32
  }
  func.func @transform_1(%arg0: i32, %arg1: i32) -> (i32, i32) {
    %c1_i32 = arith.constant 1 : i32
    %0 = arith.muli %arg0, %c1_i32 : i32
    %1 = arith.addi %0, %arg1 : i32
    %c0_i32 = arith.constant 0 : i32
    %2 = arith.minsi %1, %c0_i32 : i32
    %c0_i32_0 = arith.constant 0 : i32
    %c0_i32_1 = arith.constant 0 : i32
    return %2, %c0_i32_0 : i32, i32
  }
  func.func @transform_2(%arg0: i32, %arg1: i32) -> (i32, i32) {
    %c0_i32 = arith.constant 0 : i32
    %c0_i32_0 = arith.constant 0 : i32
    return %arg0, %c0_i32 : i32, i32
  }
}

</mosaic_0001>

<bundles_post_ra>
// kernel: l1_loss.1
= control target key start
LH: loop header
LB: loop body
LE: loop exit
PB: predicated region body
PF: predicated region fallthrough
CT: control target
= control target key end

     0   :  { %s182_s0 = inlined_call_operand.vmem [shape: f32[16,128], index: 0, kind: input, shape index: {}]   ;;  %s183_s1 = inlined_call_operand.vmem [shape: f32[16,128], index: 1, kind: input, shape index: {}]   ;;  %s184_s2 = inlined_call_operand.vmem [shape: f32[16,128], index: 2, kind: output, shape index: {}]  }
   0x1   :  { %v81_v0 = vld [vmem:[%s182_s0] sm:$0xff]  ;;  %v82_v2 = vld [vmem:[%s182_s0 + $0x8] sm:$0xff] }
   0x2   :  { %v83_v1 = vld [vmem:[%s183_s1] sm:$0xff]  ;;  %v84_v4 = vld [vmem:[%s183_s1 + $0x8] sm:$0xff] }
   0x3   :  { %v85_v3 = vsub.f32 %v81_v0, %v83_v1  ;;  %v86_v5 = vsub.f32 %v82_v2, %v84_v4 }
   0x5   :  { %v87_v6 = vand.u32 2147483647, %v85_v3  ;;  %v88_v7 = vand.u32 2147483647, %v86_v5 }
   0x7   :  { %131 = vst [vmem:[%s184_s2] sm:$0xff] %v87_v6  ;;  %132 = vst [vmem:[%s184_s2 + $0x8] sm:$0xff] %v88_v7 }

</bundles_post_ra>
